<compile_context>
chip_gen: v6e
topology: v6e:2x2x1
jax: 0.10.0
libtpu: 0.0.40
codegen_flags: <defaults>
</compile_context>

<pallas_src>
import functools

import jax
import jax.numpy as jnp
import numpy as np
from jax import lax
from jax.experimental import pallas as pl
from jax.experimental.pallas import tpu as pltpu


def _ceil_to(x, m):
    return ((x + m - 1) // m) * m


# ---------------------------------------------------------------------------
# Pallas kernel 1: fused (im2col + conv + bias + pad-mask + ReLU)
#   acc[R_out, N_pad] = sum_{tap} Wbd_tap[R_out, R_in] @ shift_tap(A[R_in, N_pad])
#   feat = (acc + bias) * valid      (pre-ReLU hooked feature, pad lanes zeroed)
#   relu = max(feat, 0)              (input of the next conv layer)
# ---------------------------------------------------------------------------
def _conv_relu_kernel(w_ref, b_ref, m_ref, a_ref, feat_ref, relu_ref, *, offsets):
    a = a_ref[...]                                   # (bt*Cin_pad, N_pad) f32
    rows, n_pad = a.shape
    r_out = feat_ref.shape[0]
    acc = jnp.zeros((r_out, n_pad), jnp.float32)
    for t, off in enumerate(offsets):                # 9 taps, unrolled (static)
        if off == 0:
            s = a
        elif off > 0:                                # s[j] = a[j + off], zero past the end
            s = jnp.concatenate(
                [a[:, off:], jnp.zeros((rows, off), a.dtype)], axis=1)
        else:                                        # s[j] = a[j + off], zero before start
            s = jnp.concatenate(
                [jnp.zeros((rows, -off), a.dtype), a[:, :n_pad + off]], axis=1)
        acc = acc + jnp.dot(w_ref[t], s, preferred_element_type=jnp.float32)
    acc = acc + b_ref[...]                           # bias (R_out, 1) broadcast over lanes
    feat = acc * m_ref[...]                          # zero the spatial-padding lanes
    feat_ref[...] = feat                             # pre-ReLU hooked feature
    relu_ref[...] = jnp.maximum(feat, 0.0)           # fused ReLU (next layer's input)


def _pick_conv_bt(two_b, bytes_per_batch, budget=6 << 20):
    """Largest divisor of 2B keeping grid >= 2 and double-buffered blocks under budget."""
    best = 1
    for bt in range(1, two_b + 1):
        if two_b % bt:
            continue
        if two_b >= 2 and two_b // bt < 2:           # keep >=2 grid steps (v7x megacore)
            continue
        if 2 * bt * bytes_per_batch > budget:        # v5e scoped VMEM default is 16 MiB
            continue
        best = bt
    return best


def conv_relu_pallas(a, w_oihw, bias, valid, *, two_b, cin_pad, cout_pad, n_pad, wdim):
    """3x3 / stride 1 / pad 1 Conv2d (PyTorch semantics) on the padded-flat layout.

    a:     (2B*Cin_pad, N_pad)  activations, padding lanes / padded channels are zero.
    Returns (feat, relu), both (2B*Cout_pad, N_pad)."""
    cout, cin = w_oihw.shape[0], w_oihw.shape[1]
    wp = wdim + 2

    bytes_per_batch = (cin_pad + 2 * cout_pad) * n_pad * 4
    bt = _pick_conv_bt(two_b, bytes_per_batch)
    nb = two_b // bt

    # Zero-pad weights/bias to padded channel counts; padded rows/cols stay exactly 0 so
    # padded channels produce exactly-zero activations (safe for the gram).
    w_p = jnp.zeros((cout_pad, cin_pad, 3, 3), jnp.float32)
    w_p = w_p.at[:cout, :cin].set(w_oihw.astype(jnp.float32))
    w_taps = jnp.transpose(w_p, (2, 3, 0, 1)).reshape(9, cout_pad, cin_pad)
    # Block-diagonal replication over the bt batches of a block -> one fat MXU matmul.
    eye = jnp.eye(bt, dtype=jnp.float32)
    w_bd = jnp.einsum("bc,tij->tbicj", eye, w_taps).reshape(
        9, bt * cout_pad, bt * cin_pad)
    b_p = jnp.zeros((cout_pad,), jnp.float32).at[:cout].set(bias.astype(jnp.float32))
    b_bd = jnp.tile(b_p, bt).reshape(bt * cout_pad, 1)

    # Flat-index offsets of the 9 taps (kh, kw) within the padded image rows.
    offsets = tuple((kh - 1) * wp + (kw - 1) for kh in range(3) for kw in range(3))
    kernel = functools.partial(_conv_relu_kernel, offsets=offsets)

    feat, relu = pl.pallas_call(
        kernel,
        out_shape=(jax.ShapeDtypeStruct((two_b * cout_pad, n_pad), jnp.float32),
                   jax.ShapeDtypeStruct((two_b * cout_pad, n_pad), jnp.float32)),
        grid_spec=pltpu.PrefetchScalarGridSpec(
            num_scalar_prefetch=0,
            grid=(nb,),
            in_specs=[
                pl.BlockSpec((9, bt * cout_pad, bt * cin_pad), lambda i: (0, 0, 0)),  # weights (resident)
                pl.BlockSpec((bt * cout_pad, 1), lambda i: (0, 0)),                   # bias    (resident)
                pl.BlockSpec((1, n_pad), lambda i: (0, 0)),                           # valid mask (resident)
                pl.BlockSpec((bt * cin_pad, n_pad), lambda i: (i, 0)),                # activation block
            ],
            out_specs=[pl.BlockSpec((bt * cout_pad, n_pad), lambda i: (i, 0))] * 2,
        ),
        compiler_params=pltpu.CompilerParams(
            dimension_semantics=("parallel",),
        ),
        cost_estimate=pl.CostEstimate(
            flops=2 * 9 * two_b * cout_pad * cin_pad * n_pad,
            transcendentals=0,
            bytes_accessed=4 * (two_b * cin_pad * n_pad + 2 * two_b * cout_pad * n_pad),
        ),
    )(w_bd, b_bd, valid, a)
    return feat, relu


# ---------------------------------------------------------------------------
# Pallas kernel 2: fat block-gram + L1 partial
#   GX = X X^T, GY = Y Y^T over a (bt_g*C_pad, N_pad) block; |GX-GY| masked to the
#   per-batch block-diagonal C_pad x C_pad blocks; one cross-lane sum; one store.
# ---------------------------------------------------------------------------
def _gram_l1_kernel(m_ref, x_ref, y_ref, o_ref):
    dn = (((1,), (1,)), ((), ()))      # contract lane axis of both operands (A @ A^T)
    x = x_ref[...]
    y = y_ref[...]
    gx = lax.dot_general(x, x, dn, preferred_element_type=jnp.float32)
    gy = lax.dot_general(y, y, dn, preferred_element_type=jnp.float32)
    d = jnp.abs(gx - gy) * m_ref[...]  # keep only same-batch (block-diagonal) gram blocks
    o_ref[...] = jnp.full((8, 128), jnp.sum(d), dtype=jnp.float32)


def _pick_gram_bt(b, c_pad, n_pad, budget=6 << 20):
    """Largest divisor of B keeping nblk >= 2 (v7x) and blocks under the VMEM budget."""
    best = 1
    for bt in range(1, b + 1):
        if b % bt:
            continue
        if b >= 2 and b // bt < 2:
            continue
        if bt * c_pad > 512:
            continue
        if 2 * 2 * bt * c_pad * n_pad * 4 > budget:
            continue
        best = bt
    return best


def gram_l1_pallas(feat, b, cout, c_pad, n_pad):
    """feat: (2B*C_pad, N_pad), x batches in rows [0, B*C_pad), gt batches after.
    Returns mean |gram_x - gram_y| over (B, C, C) (torch l1_loss default reduction)."""
    bt_g = _pick_gram_bt(b, c_pad, n_pad)
    nblk = b // bt_g
    r = bt_g * c_pad
    # Block-diagonal mask: 1 where row-batch == col-batch (built host-side, resident).
    mask = jnp.kron(jnp.eye(bt_g, dtype=jnp.float32),
                    jnp.ones((c_pad, c_pad), jnp.float32))

    partials = pl.pallas_call(
        _gram_l1_kernel,
        out_shape=jax.ShapeDtypeStruct((8 * nblk, 128), jnp.float32),
        grid_spec=pltpu.PrefetchScalarGridSpec(
            num_scalar_prefetch=0,
            grid=(nblk,),
            in_specs=[
                pl.BlockSpec((r, r), lambda i: (0, 0)),                # mask (resident)
                pl.BlockSpec((r, n_pad), lambda i: (i, 0)),            # x batches
                pl.BlockSpec((r, n_pad), lambda i: (i + nblk, 0)),     # gt batches
            ],
            out_specs=pl.BlockSpec((8, 128), lambda i: (i, 0)),        # lane-dense partials
        ),
        compiler_params=pltpu.CompilerParams(
            dimension_semantics=("parallel",),
        ),
        cost_estimate=pl.CostEstimate(
            flops=2 * 2 * b * c_pad * c_pad * n_pad,
            transcendentals=0,
            bytes_accessed=4 * (2 * b * c_pad * n_pad + 8 * nblk * 128),
        ),
    )(mask, feat, feat)
    # Padded channels / padded lanes are exactly zero, so the masked sum equals the sum
    # over the true (C, C) grams; normalize by the true element count (l1_loss 'mean').
    return jnp.sum(partials[::8, 0]) / jnp.float32(b * cout * cout)


# ---------------------------------------------------------------------------
# Feature extractor (hooked pre-ReLU conv outputs) + PerceptualLoss forward
# ---------------------------------------------------------------------------
def perceptual_loss(x_nchw, gt_nchw, params):
    B, cin0, H, W = x_nchw.shape
    two_b = 2 * B
    hp, wp = H + 2, W + 2
    lsp = hp * wp
    n_pad = _ceil_to(lsp, 128)          # lane-dense flat spatial dim (128-multiple)

    # Valid-position mask over the padded-flat spatial layout (rows 1..H, cols 1..W).
    j = jnp.arange(n_pad)
    rr, cc = j // wp, j % wp
    valid = ((j < lsp) & (rr >= 1) & (rr <= H) & (cc >= 1) & (cc <= W))
    valid = valid.astype(jnp.float32).reshape(1, n_pad)

    # Layer-0 activation in padded-flat layout: (2B*Cin_pad, N_pad), zeros in all padding.
    cin_pad = _ceil_to(cin0, 8)
    a = jnp.concatenate([x_nchw, gt_nchw], axis=0).astype(jnp.float32)   # (2B,Cin,H,W)
    a = jnp.pad(a, ((0, 0), (0, cin_pad - cin0), (1, 1), (1, 1)))        # channel+spatial pad
    a = a.reshape(two_b, cin_pad, lsp)
    a = jnp.pad(a, ((0, 0), (0, 0), (0, n_pad - lsp)))
    a = a.reshape(two_b * cin_pad, n_pad)

    loss = jnp.float32(0.0)
    for (w, bias) in params:
        cout = w.shape[0]
        cout_pad = _ceil_to(cout, 8)
        feat, a = conv_relu_pallas(a, w, bias, valid,
                                   two_b=two_b, cin_pad=cin_pad, cout_pad=cout_pad,
                                   n_pad=n_pad, wdim=W)
        loss = loss + gram_l1_pallas(feat, B, cout, cout_pad, n_pad)
        cin_pad = cout_pad               # relu output is already next layer's input layout
    return loss


# ---------------------------------------------------------------------------
# Pure-JAX reference (for sanity check)
# ---------------------------------------------------------------------------
def reference_loss(x, gt, params):
    def feats(inp):
        out, a = [], inp
        for (w, b) in params:
            f = lax.conv_general_dilated(
                a, w, (1, 1), "SAME",
                dimension_numbers=("NCHW", "OIHW", "NCHW"),
            ) + b.reshape(1, -1, 1, 1)
            out.append(f)
            a = jnp.maximum(f, 0.0)
        return out

    fx, fy = feats(x), feats(gt)
    loss = jnp.float32(0.0)
    for a, c in zip(fx, fy):
        Bb, C, H, W = a.shape
        ax = a.reshape(Bb, C, -1)
        ay = c.reshape(Bb, C, -1)
        gx = ax @ jnp.transpose(ax, (0, 2, 1))
        gy = ay @ jnp.transpose(ay, (0, 2, 1))
        loss = loss + jnp.mean(jnp.abs(gx - gy))
    return loss


if __name__ == "__main__":
    key = jax.random.PRNGKey(0)
    k_in, k_gt, k_p = jax.random.split(key, 3)

    # Deterministic synthetic conv parameters (OIHW weights + bias), 3 layers.
    layer_dims = [(3, 8), (8, 8), (8, 16)]  # (Cin, Cout)
    params = []
    pkeys = jax.random.split(k_p, len(layer_dims))
    for (cin, cout), pk in zip(layer_dims, pkeys):
        wk, bk = jax.random.split(pk)
        w = 0.1 * jax.random.normal(wk, (cout, cin, 3, 3), dtype=jnp.float32)
        b = 0.05 * jax.random.normal(bk, (cout,), dtype=jnp.float32)
        params.append((w, b))

    # Inputs: NCHW, batch=2, channels=3, spatial=16x16
    x = jax.random.normal(k_in, (2, 3, 16, 16), dtype=jnp.float32)
    gt = jax.random.normal(k_gt, (2, 3, 16, 16), dtype=jnp.float32)

    loss = jax.block_until_ready(perceptual_loss(x, gt, params))
    ref = jax.block_until_ready(reference_loss(x, gt, params))

    np.testing.assert_allclose(np.asarray(loss), np.asarray(ref),
                               rtol=1e-3, atol=1e-4)
    print("KERNEL_OK")
</pallas_src>

<mosaic_0001>
module attributes {stable_mosaic.version = 11 : i64} {
  func.func @_conv_relu_kernel(%arg0: i32, %arg1: memref<9x16x16xf32, #tpu.memory_space<vmem>>, %arg2: memref<16x1xf32, #tpu.memory_space<vmem>>, %arg3: memref<1x384xf32, #tpu.memory_space<vmem>>, %arg4: memref<16x384xf32, #tpu.memory_space<vmem>>, %arg5: memref<16x384xf32, #tpu.memory_space<vmem>>, %arg6: memref<16x384xf32, #tpu.memory_space<vmem>>) attributes {dimension_semantics = [#tpu.dimension_semantics<parallel>], iteration_bounds = array<i64: 2>, scalar_prefetch = 0 : i64, scratch_operands = 0 : i64, tpu.core_type = #tpu.core_type<tc>, window_params = [{pipeline_mode = #tpu.pipeline_mode<synchronous>, transform_indices = @transform_0, window_bounds = array<i64: 9, 16, 16>}, {pipeline_mode = #tpu.pipeline_mode<synchronous>, transform_indices = @transform_1, window_bounds = array<i64: 16, 1>}, {pipeline_mode = #tpu.pipeline_mode<synchronous>, transform_indices = @transform_2, window_bounds = array<i64: 1, 384>}, {transform_indices = @transform_3, window_bounds = array<i64: 16, 384>}, {transform_indices = @transform_4, window_bounds = array<i64: 16, 384>}, {transform_indices = @transform_5, window_bounds = array<i64: 16, 384>}]} {
    %c0 = arith.constant 0 : index
    %c0_0 = arith.constant 0 : index
    %0 = vector.load %arg4[%c0, %c0_0] : memref<16x384xf32, #tpu.memory_space<vmem>>, vector<16x384xf32>
    %cst = arith.constant 0.000000e+00 : f32
    %1 = vector.broadcast %cst : f32 to vector<16x384xf32>
    %cst_1 = arith.constant 0.000000e+00 : f32
    %2 = vector.broadcast %cst_1 : f32 to vector<16x19xf32>
    %3 = vector.extract_strided_slice %0 {offsets = [0, 0], sizes = [16, 365], strides = [1, 1]} : vector<16x384xf32> to vector<16x365xf32>
    %4 = tpu.concatenate %2, %3 in 1 : vector<16x19xf32>, vector<16x365xf32> -> vector<16x384xf32>
    %c0_2 = arith.constant 0 : index
    %c0_3 = arith.constant 0 : index
    %c0_4 = arith.constant 0 : index
    %5 = vector.load %arg1[%c0_2, %c0_3, %c0_4] : memref<9x16x16xf32, #tpu.memory_space<vmem>>, vector<1x16x16xf32>
    %6 = vector.shape_cast %5 : vector<1x16x16xf32> to vector<16x16xf32>
    %cst_5 = arith.constant dense<0.000000e+00> : vector<16x384xf32>
    %7 = tpu.matmul %6, %4, %cst_5 {dimension_numbers = #tpu.dot_dimension_numbers<[1], [0], [0], [1], [0, 0, 1, 1], [], []>} : vector<16x16xf32>, vector<16x384xf32>, vector<16x384xf32> -> vector<16x384xf32>
    %8 = arith.addf %1, %7 : vector<16x384xf32>
    %cst_6 = arith.constant 0.000000e+00 : f32
    %9 = vector.broadcast %cst_6 : f32 to vector<16x18xf32>
    %10 = vector.extract_strided_slice %0 {offsets = [0, 0], sizes = [16, 366], strides = [1, 1]} : vector<16x384xf32> to vector<16x366xf32>
    %11 = tpu.concatenate %9, %10 in 1 : vector<16x18xf32>, vector<16x366xf32> -> vector<16x384xf32>
    %c1 = arith.constant 1 : index
    %c0_7 = arith.constant 0 : index
    %c0_8 = arith.constant 0 : index
    %12 = vector.load %arg1[%c1, %c0_7, %c0_8] : memref<9x16x16xf32, #tpu.memory_space<vmem>>, vector<1x16x16xf32>
    %13 = vector.shape_cast %12 : vector<1x16x16xf32> to vector<16x16xf32>
    %cst_9 = arith.constant dense<0.000000e+00> : vector<16x384xf32>
    %14 = tpu.matmul %13, %11, %cst_9 {dimension_numbers = #tpu.dot_dimension_numbers<[1], [0], [0], [1], [0, 0, 1, 1], [], []>} : vector<16x16xf32>, vector<16x384xf32>, vector<16x384xf32> -> vector<16x384xf32>
    %15 = arith.addf %8, %14 : vector<16x384xf32>
    %cst_10 = arith.constant 0.000000e+00 : f32
    %16 = vector.broadcast %cst_10 : f32 to vector<16x17xf32>
    %17 = vector.extract_strided_slice %0 {offsets = [0, 0], sizes = [16, 367], strides = [1, 1]} : vector<16x384xf32> to vector<16x367xf32>
    %18 = tpu.concatenate %16, %17 in 1 : vector<16x17xf32>, vector<16x367xf32> -> vector<16x384xf32>
    %c2 = arith.constant 2 : index
    %c0_11 = arith.constant 0 : index
    %c0_12 = arith.constant 0 : index
    %19 = vector.load %arg1[%c2, %c0_11, %c0_12] : memref<9x16x16xf32, #tpu.memory_space<vmem>>, vector<1x16x16xf32>
    %20 = vector.shape_cast %19 : vector<1x16x16xf32> to vector<16x16xf32>
    %cst_13 = arith.constant dense<0.000000e+00> : vector<16x384xf32>
    %21 = tpu.matmul %20, %18, %cst_13 {dimension_numbers = #tpu.dot_dimension_numbers<[1], [0], [0], [1], [0, 0, 1, 1], [], []>} : vector<16x16xf32>, vector<16x384xf32>, vector<16x384xf32> -> vector<16x384xf32>
    %22 = arith.addf %15, %21 : vector<16x384xf32>
    %cst_14 = arith.constant 0.000000e+00 : f32
    %23 = vector.broadcast %cst_14 : f32 to vector<16x1xf32>
    %24 = vector.extract_strided_slice %0 {offsets = [0, 0], sizes = [16, 383], strides = [1, 1]} : vector<16x384xf32> to vector<16x383xf32>
    %25 = tpu.concatenate %23, %24 in 1 : vector<16x1xf32>, vector<16x383xf32> -> vector<16x384xf32>
    %c3 = arith.constant 3 : index
    %c0_15 = arith.constant 0 : index
    %c0_16 = arith.constant 0 : index
    %26 = vector.load %arg1[%c3, %c0_15, %c0_16] : memref<9x16x16xf32, #tpu.memory_space<vmem>>, vector<1x16x16xf32>
    %27 = vector.shape_cast %26 : vector<1x16x16xf32> to vector<16x16xf32>
    %cst_17 = arith.constant dense<0.000000e+00> : vector<16x384xf32>
    %28 = tpu.matmul %27, %25, %cst_17 {dimension_numbers = #tpu.dot_dimension_numbers<[1], [0], [0], [1], [0, 0, 1, 1], [], []>} : vector<16x16xf32>, vector<16x384xf32>, vector<16x384xf32> -> vector<16x384xf32>
    %29 = arith.addf %22, %28 : vector<16x384xf32>
    %c4 = arith.constant 4 : index
    %c0_18 = arith.constant 0 : index
    %c0_19 = arith.constant 0 : index
    %30 = vector.load %arg1[%c4, %c0_18, %c0_19] : memref<9x16x16xf32, #tpu.memory_space<vmem>>, vector<1x16x16xf32>
    %31 = vector.shape_cast %30 : vector<1x16x16xf32> to vector<16x16xf32>
    %cst_20 = arith.constant dense<0.000000e+00> : vector<16x384xf32>
    %32 = tpu.matmul %31, %0, %cst_20 {dimension_numbers = #tpu.dot_dimension_numbers<[1], [0], [0], [1], [0, 0, 1, 1], [], []>} : vector<16x16xf32>, vector<16x384xf32>, vector<16x384xf32> -> vector<16x384xf32>
    %33 = arith.addf %29, %32 : vector<16x384xf32>
    %34 = vector.extract_strided_slice %0 {offsets = [0, 1], sizes = [16, 383], strides = [1, 1]} : vector<16x384xf32> to vector<16x383xf32>
    %cst_21 = arith.constant 0.000000e+00 : f32
    %35 = vector.broadcast %cst_21 : f32 to vector<16x1xf32>
    %36 = tpu.concatenate %34, %35 in 1 : vector<16x383xf32>, vector<16x1xf32> -> vector<16x384xf32>
    %c5 = arith.constant 5 : index
    %c0_22 = arith.constant 0 : index
    %c0_23 = arith.constant 0 : index
    %37 = vector.load %arg1[%c5, %c0_22, %c0_23] : memref<9x16x16xf32, #tpu.memory_space<vmem>>, vector<1x16x16xf32>
    %38 = vector.shape_cast %37 : vector<1x16x16xf32> to vector<16x16xf32>
    %cst_24 = arith.constant dense<0.000000e+00> : vector<16x384xf32>
    %39 = tpu.matmul %38, %36, %cst_24 {dimension_numbers = #tpu.dot_dimension_numbers<[1], [0], [0], [1], [0, 0, 1, 1], [], []>} : vector<16x16xf32>, vector<16x384xf32>, vector<16x384xf32> -> vector<16x384xf32>
    %40 = arith.addf %33, %39 : vector<16x384xf32>
    %41 = vector.extract_strided_slice %0 {offsets = [0, 17], sizes = [16, 367], strides = [1, 1]} : vector<16x384xf32> to vector<16x367xf32>
    %cst_25 = arith.constant 0.000000e+00 : f32
    %42 = vector.broadcast %cst_25 : f32 to vector<16x17xf32>
    %43 = tpu.concatenate %41, %42 in 1 : vector<16x367xf32>, vector<16x17xf32> -> vector<16x384xf32>
    %c6 = arith.constant 6 : index
    %c0_26 = arith.constant 0 : index
    %c0_27 = arith.constant 0 : index
    %44 = vector.load %arg1[%c6, %c0_26, %c0_27] : memref<9x16x16xf32, #tpu.memory_space<vmem>>, vector<1x16x16xf32>
    %45 = vector.shape_cast %44 : vector<1x16x16xf32> to vector<16x16xf32>
    %cst_28 = arith.constant dense<0.000000e+00> : vector<16x384xf32>
    %46 = tpu.matmul %45, %43, %cst_28 {dimension_numbers = #tpu.dot_dimension_numbers<[1], [0], [0], [1], [0, 0, 1, 1], [], []>} : vector<16x16xf32>, vector<16x384xf32>, vector<16x384xf32> -> vector<16x384xf32>
    %47 = arith.addf %40, %46 : vector<16x384xf32>
    %48 = vector.extract_strided_slice %0 {offsets = [0, 18], sizes = [16, 366], strides = [1, 1]} : vector<16x384xf32> to vector<16x366xf32>
    %cst_29 = arith.constant 0.000000e+00 : f32
    %49 = vector.broadcast %cst_29 : f32 to vector<16x18xf32>
    %50 = tpu.concatenate %48, %49 in 1 : vector<16x366xf32>, vector<16x18xf32> -> vector<16x384xf32>
    %c7 = arith.constant 7 : index
    %c0_30 = arith.constant 0 : index
    %c0_31 = arith.constant 0 : index
    %51 = vector.load %arg1[%c7, %c0_30, %c0_31] : memref<9x16x16xf32, #tpu.memory_space<vmem>>, vector<1x16x16xf32>
    %52 = vector.shape_cast %51 : vector<1x16x16xf32> to vector<16x16xf32>
    %cst_32 = arith.constant dense<0.000000e+00> : vector<16x384xf32>
    %53 = tpu.matmul %52, %50, %cst_32 {dimension_numbers = #tpu.dot_dimension_numbers<[1], [0], [0], [1], [0, 0, 1, 1], [], []>} : vector<16x16xf32>, vector<16x384xf32>, vector<16x384xf32> -> vector<16x384xf32>
    %54 = arith.addf %47, %53 : vector<16x384xf32>
    %55 = vector.extract_strided_slice %0 {offsets = [0, 19], sizes = [16, 365], strides = [1, 1]} : vector<16x384xf32> to vector<16x365xf32>
    %cst_33 = arith.constant 0.000000e+00 : f32
    %56 = vector.broadcast %cst_33 : f32 to vector<16x19xf32>
    %57 = tpu.concatenate %55, %56 in 1 : vector<16x365xf32>, vector<16x19xf32> -> vector<16x384xf32>
    %c8 = arith.constant 8 : index
    %c0_34 = arith.constant 0 : index
    %c0_35 = arith.constant 0 : index
    %58 = vector.load %arg1[%c8, %c0_34, %c0_35] : memref<9x16x16xf32, #tpu.memory_space<vmem>>, vector<1x16x16xf32>
    %59 = vector.shape_cast %58 : vector<1x16x16xf32> to vector<16x16xf32>
    %cst_36 = arith.constant dense<0.000000e+00> : vector<16x384xf32>
    %60 = tpu.matmul %59, %57, %cst_36 {dimension_numbers = #tpu.dot_dimension_numbers<[1], [0], [0], [1], [0, 0, 1, 1], [], []>} : vector<16x16xf32>, vector<16x384xf32>, vector<16x384xf32> -> vector<16x384xf32>
    %61 = arith.addf %54, %60 : vector<16x384xf32>
    %c0_37 = arith.constant 0 : index
    %c0_38 = arith.constant 0 : index
    %62 = vector.load %arg2[%c0_37, %c0_38] : memref<16x1xf32, #tpu.memory_space<vmem>>, vector<16x1xf32>
    %63 = vector.broadcast %62 : vector<16x1xf32> to vector<16x384xf32>
    %64 = arith.addf %61, %63 : vector<16x384xf32>
    %c0_39 = arith.constant 0 : index
    %c0_40 = arith.constant 0 : index
    %65 = vector.load %arg3[%c0_39, %c0_40] : memref<1x384xf32, #tpu.memory_space<vmem>>, vector<1x384xf32>
    %66 = vector.broadcast %65 : vector<1x384xf32> to vector<16x384xf32>
    %67 = arith.mulf %64, %66 : vector<16x384xf32>
    %c0_41 = arith.constant 0 : index
    %c0_42 = arith.constant 0 : index
    %68 = vector.load %arg5[%c0_41, %c0_42] : memref<16x384xf32, #tpu.memory_space<vmem>>, vector<16x384xf32>
    tpu.vector_store %arg5[%c0_41, %c0_42], %67 {strides = array<i32>} : memref<16x384xf32, #tpu.memory_space<vmem>>, vector<16x384xf32>,
    %cst_43 = arith.constant 0.000000e+00 : f32
    %69 = vector.broadcast %cst_43 : f32 to vector<16x384xf32>
    %70 = arith.maximumf %67, %69 : vector<16x384xf32>
    %c0_44 = arith.constant 0 : index
    %c0_45 = arith.constant 0 : index
    %71 = vector.load %arg6[%c0_44, %c0_45] : memref<16x384xf32, #tpu.memory_space<vmem>>, vector<16x384xf32>
    tpu.vector_store %arg6[%c0_44, %c0_45], %70 {strides = array<i32>} : memref<16x384xf32, #tpu.memory_space<vmem>>, vector<16x384xf32>,
    return
  }
  func.func @transform_0(%arg0: i32) -> (i32, i32, i32) {
    %c0_i32 = arith.constant 0 : i32
    %c0_i32_0 = arith.constant 0 : i32
    %c0_i32_1 = arith.constant 0 : i32
    %c0_i32_2 = arith.constant 0 : i32
    return %c0_i32, %c0_i32_0, %c0_i32_1 : i32, i32, i32
  }
  func.func @transform_1(%arg0: i32) -> (i32, i32) {
    %c0_i32 = arith.constant 0 : i32
    %c0_i32_0 = arith.constant 0 : i32
    %c0_i32_1 = arith.constant 0 : i32
    return %c0_i32, %c0_i32_0 : i32, i32
  }
  func.func @transform_2(%arg0: i32) -> (i32, i32) {
    %c0_i32 = arith.constant 0 : i32
    %c0_i32_0 = arith.constant 0 : i32
    %c0_i32_1 = arith.constant 0 : i32
    return %c0_i32, %c0_i32_0 : i32, i32
  }
  func.func @transform_3(%arg0: i32) -> (i32, i32) {
    %c0_i32 = arith.constant 0 : i32
    %c0_i32_0 = arith.constant 0 : i32
    return %arg0, %c0_i32 : i32, i32
  }
  func.func @transform_4(%arg0: i32) -> (i32, i32) {
    %c0_i32 = arith.constant 0 : i32
    %c0_i32_0 = arith.constant 0 : i32
    return %arg0, %c0_i32 : i32, i32
  }
  func.func @transform_5(%arg0: i32) -> (i32, i32) {
    %c0_i32 = arith.constant 0 : i32
    %c0_i32_0 = arith.constant 0 : i32
    return %arg0, %c0_i32 : i32, i32
  }
}

</mosaic_0001>

<bundles_post_ra>
// kernel: tpu_custom_call.1
= control target key start
LH: loop header
LB: loop body
LE: loop exit
PB: predicated region body
PF: predicated region fallthrough
CT: control target
= control target key end

     0   :  { %11 = vsyncpa [#allocation3], 0  ;;  %s3091_s0 = inlined_call_operand.hbm [shape: f32[9,16,16], index: 0, kind: input, shape index: {}]   ;;  %s3092_s1 = inlined_call_operand.vmem [shape: f32[16,1], index: 1, kind: input, shape index: {}]   ;;  %s3093_s2 = inlined_call_operand.vmem [shape: f32[1,384], index: 2, kind: input, shape index: {}]   ;;  %s3094_s3 = inlined_call_operand.hbm [shape: f32[32,384], index: 3, kind: input, shape index: {}]   ;;  %s3095_s4 = inlined_call_operand.hbm [shape: f32[32,384], index: 4, kind: output, shape index: {0}]   ;;  %s3096_s5 = inlined_call_operand.hbm [shape: f32[32,384], index: 5, kind: output, shape index: {1}]  }
   0x1   :  { %12 = vsyncpa [#allocation6], 0 }
   0x2   :  { %14 = vsyncpa [#allocation6 + $0x1], 0 }
   0x3   :  { %15 = vsyncpa [#allocation4], 0 }
   0x4   :  { %17 = vsyncpa [#allocation4 + $0x1], 0 }
   0x5   :  { %18 = vsyncpa [#allocation9], 0 }
   0x6   :  { %20 = vsyncpa [#allocation9 + $0x1], 0  ;;  %s2654_s18 = smov 0   ;;  %s2656_s19 = smov 0  }
   0x7   :  { %s2658_s20 = smov 0   ;;  %s2660_s21 = smov 0  }
   0x8 LB: > { %s2675_s22 = sadd.s32 4294967295, %s2602_s21   ;;  %s2189_s23 = sadd.s32 4294967294, %s2602_s21   ;;  %s2602_s21 = sphi %s2660_s21, %s3122_s21   ;;  %s2598_s20 = sphi %s2658_s20, %s3121_s20   ;;  %s2594_s19 = sphi %s2656_s19, %s3120_s19   ;;  %s2590_s18 = sphi %s2654_s18, %s3119_s18  }
   0x9   : > { %p109_p0 = scmp.ne.s32.totalorder %s2594_s19, %s2590_s18  ;;  %p3097_p1 = scmp.eq.s32.totalorder %s2675_s22, 0 }
   0xa   : > { %p139_p3 = scmp.eq.s32.totalorder %s2189_s23, 1  ;;  %p2190_p5 = scmp.ge.s32.totalorder %s2602_s21, 1 }
   0xb   : > { %p2684_p4 = por %p3097_p1, %p109_p0  ;;  %p172_p7 = scmp.lt.s32.totalorder %s2602_s21, 3 }
   0xc   : > { %p2689_p6 = por %p139_p3, %p109_p0  ;;  %s2604_s27 = smov [#allocation2]  }
   0xd   : > { %s3101_s24 = scalar_select %p2684_p4, 1, 0 }
   0xe   : > { %s3102_s25 = scalar_select %p2689_p6, 1, 0 }
   0xf   : > { %p2694_p8 = pnand %p2190_p5, %p172_p7  ;;  %s184_s28 = sshll.u32 %s2604_s27, 4  ;;  %s185_s28 = int_to_ptr.vmem [resolvable:$true] %s184_s28 }
  0x10   : > { %s2708_s30 = sadd.s32 1, %s2602_s21   ;;  %s96_s6 = sadd.s32 1, %s2598_s20 }
  0x11   : > { %s3103_s26 = scalar_select %p2694_p8, 1, 0 }
  0x12   : > { %p2380_p9 = pneg %p2694_p8  ;;  %s93_s7 = ssub.s32 %s2602_s21, %s2708_s30 }
  0x13   : > { %s2461_s8 = scalar_lea.vmem %s185_s28, 2304  ;;  %p2469_p5 = scmp.lt.s32.totalorder %s185_s28, %s185_s28 }
  0x14   : > { %p2703_p11 = pnand %p2380_p9, %p3097_p1  ;;  %p2462_p13 = scmp.ne.s32.totalorder %s185_s28, %s2461_s8 }
  0x15   : > { %p2470_p7 = scmp.lt.s32.totalorder %s2461_s8, %s2461_s8 }
  0x16   : > { %p2452_p12 = pneg %p2703_p11 }
  0x17   : > { %p2471_p10 = por %p2470_p7, %p2469_p5 }
  0x18   : > { %p2464_p0 = pnand %p2462_p13, %p2452_p12 }
  0x1a   : > { %p2465_p3 = pneg %p2464_p0 }
  0x1c   : > { %p2472_p2 = pnand %p2471_p10, %p2465_p3 }
  0x1e   : > { %2475 = shalt.err (!%p2472_p2)
}
  0x1f   : > { %s2605_s9 = smov 128   ;;  %s2606_s10 = smov 8  }
  0x20   : > { %2383 = dma.hbm_to_vmem [thread:$0]  (!%p2703_p11), %s3091_s0, 2304, %s185_s28, [#allocation3], %s2605_s9, %s2605_s9, %s2606_s10  }
  0x21   : > { %p94_p9 = scmp.eq.s32.totalorder %s93_s7, 0  ;;  %p103_p12 = scmp.ne.s32.totalorder %s2598_s20, %s2594_s19 }
  0x22   : > { %p104_p10 = scmp.eq.s32.totalorder %s2602_s21, 0  ;;  %p2396_p2 = scmp.lt.s32.totalorder %s2602_s21, 2 }
  0x23   : > { %s2725_s13 = scalar_select %p94_p9, %s2598_s20, %s96_s6  }
  0x24   : > { %p105_p13 = por %p104_p10, %p103_p12  ;;  %p3105_p0 = scmp.eq.s32.totalorder %s2675_s22, 1 }
  0x25   : > { %s204_s15 = sand.u32 1, %s2598_s20   ;;  %s2366_s16 = smul.u32 768, %s2602_s21 }
  0x26   : > { %p2729_p3 = por %p3105_p0, %p103_p12  ;;  %s2365_s17 = smul.u32 48, %s204_s15 }
  0x27   : > { %s2738_s29 = scalar_lea.hbm %s3094_s3, %s2366_s16  ;;  %p2740_p11 = pnand %p2396_p2, %p105_p13 }
  0x28   : > { %s3106_s14 = scalar_select %p2729_p3, 1, 0 }
  0x29   : > { %s208_s6 = scalar_lea.vmem [#allocation5], %s2365_s17  ;;  %s2746_s8 = scalar_lea.sflag [#allocation6], %s204_s15 }
  0x2a   : > { %s216_s7 = sshll.u32 %s208_s6, 4  ;;  %s2476_s9 = scalar_lea.hbm %s2738_s29, 768  ;;  %s2744_s7 = int_to_ptr.vmem [resolvable:$true] %s216_s7 }
  0x2b   : > { %p2477_p5 = scmp.ne.s32.totalorder %s2738_s29, %s2476_s9  ;;  %p2478_p7 = pneg %p2740_p11 }
  0x2c   : > { %s2481_s12 = scalar_lea.hbm %s3094_s3, 1536  ;;  %p2482_p10 = scmp.lt.s32.totalorder %s2738_s29, %s3094_s3 }
  0x2d   : > { %p2479_p9 = pnand %p2478_p7, %p2477_p5  ;;  %p2483_p2 = scmp.lt.s32.totalorder %s2481_s12, %s2476_s9 }
  0x2f   : > { %p2480_p12 = pneg %p2479_p9  ;;  %p2484_p13 = por %p2483_p2, %p2482_p10 }
  0x31   : > { %p2485_p0 = pnand %p2484_p13, %p2480_p12 }
  0x33   : > { %2488 = shalt.err (!%p2485_p0)
}
  0x34   : > { %s2489_s15 = scalar_lea.vmem %s2744_s7, 768  ;;  %s2607_s17 = smov [#allocation5]  }
  0x35   : > { %p2490_p1 = scmp.ne.s32.totalorder %s2744_s7, %s2489_s15  ;;  %s2494_s27 = sshll.u32 %s2607_s17, 4  ;;  %s2495_s27 = int_to_ptr.vmem [resolvable:$false] %s2494_s27 }
  0x36   : > { %s2496_s6 = scalar_lea.vmem %s2495_s27, 1536  ;;  %p2497_p9 = scmp.lt.s32.totalorder %s2744_s7, %s2495_s27 }
  0x37   : > { %p2492_p6 = pnand %p2490_p1, %p2478_p7  ;;  %p2498_p3 = scmp.lt.s32.totalorder %s2496_s6, %s2489_s15 }
  0x39   : > { %p2493_p5 = pneg %p2492_p6  ;;  %p2499_p4 = por %p2498_p3, %p2497_p9 }
  0x3b   : > { %p2500_p8 = pnand %p2499_p4, %p2493_p5 }
  0x3d   : > { %2503 = shalt.err (!%p2500_p8)
}
  0x3e   : > { %s2608_s9 = smov 384   ;;  %s2609_s10 = smov 24  }
  0x3f   : > { %2387 = dma.hbm_to_vmem [thread:$0]  (!%p2740_p11), %s2738_s29, 768, %s2744_s7, %s2746_s8, %s2608_s9, %s2608_s9, %s2609_s10  }
  0x40   : > { %p3108_p1 = scmp.ne.s32.totalorder %s3103_s26, 0 }
  0x41   : > { %p3109_p6 = scmp.eq.s32.totalorder (!%p3108_p1), %s2675_s22, 0 }
  0x42   : > { %228 = sbr.rel (%p3108_p1) target bundleno = 529 (0x211), region = 36 }
  0x47   : > { %2573 = dma.done.wait (%p3109_p6), [#allocation3], 2304   ;;  %p3110_p7 = pmov %p3109_p6 }
  0x48   : > { %s2774_s11 = sand.u32 1, %s2594_s19   ;;  %p3111_p4 = scmp.ne.s32.totalorder %s3101_s24, 0 }
  0x49   : > { %2575 = vsyncadd (%p3110_p7), [#allocation3], 4294964992  ;;  %s2777_s12 = smul.u32 48, %s2774_s11  ;;  %s235_s28 = scalar_lea.sflag [#allocation6], %s2774_s11 }
  0x4b   : > { %s238_s29 = scalar_lea.vmem [#allocation5], %s2777_s12 }
  0x4c   : > { %2577 = dma.done.wait (%p3111_p4), %s235_s28, 768  }
  0x4d   : > { %2579 = vsyncadd (%p3111_p4), %s235_s28, 4294966528  ;;  %v2785_v0 = vld [vmem:[%s238_s29 + $0x18] sm:$0xff]  ;;  %v2787_v1 = vld [vmem:[%s238_s29] sm:$0xff]  ;;  %vm340_vm0 = vcmask 130048   ;;  %s2610_s26 = smov 18   ;;  %v2611_v5 = vmov 0.0  }
  0x4e   : > { %318 = vrot.lane.b32.xlu0 %v2785_v0, %s2610_s26  ;;  %312 = vrot.lane.b32.xlu1 %v2787_v1, %s2610_s26  ;;  %v2791_v2 = vld [vmem:[#allocation2 + $0x10] sm:$0xff]  ;;  %v2795_v4 = vld [vmem:[%s238_s29 + $0x8] sm:$0xff]  ;;  %s2612_s24 = smov 19   ;;  %s2613_s7 = smov 17   ;;  %v2619_v8 = vmov 0   ;;  %v1976_v10 = vld [vmem:[%s3092_s1] sm:$0xff] }
  0x4f   : > { %v2793_v3 = vld [vmem:[%s238_s29 + $0x20] sm:$0xff]  ;;  %2306 = vmatprep.mubr.msk.f32.mxu1 %vm340_vm0, %v2791_v2  ;;  %411 = vmatprep.mubr.f32.mxu0 %v2611_v5  ;;  %v2802_v6 = vld [vmem:[%s238_s29 + $0x28] sm:$0xff]  ;;  %v2804_v7 = vld [vmem:[%s238_s29 + $0x10] sm:$0xff]  ;;  %s2614_s8 = smov 1   ;;  %s2615_s16 = smov 127   ;;  %vm324_vm1 = vcmask 146432  }
  0x50   : > { %s2616_s23 = smov 111   ;;  %s2617_s15 = smov 110   ;;  %2449 = vset.pattern.permute.xlu1 %v2619_v8  ;;  %2448 = vset.pattern.permute.xlu0 %v2619_v8  ;;  %v1977_v9 = vld [vmem:[%s3092_s1 + $0x8] sm:$0xff]  ;;  %vm2198_vm2 = vmneg %vm324_vm1  ;;  %vm297_vm3 = vcmask 154624   ;;  %v339_v21 = vld [vmem:[#allocation2 + $0x18] sm:$0xff]  ;;  %vm669_vm5 = vcmask 138240  }
  0x51   : > { %s2618_s17 = smov 109   ;;  %vm2865_vm4 = vmneg %vm297_vm3  ;;  %v310_v26 = vld [vmem:[#allocation2] sm:$0xff]  ;;  %v311_v34 = vld [vmem:[#allocation2 + $0x8] sm:$0xff]  ;;  %vm861_vm7 = vcmask 7168   ;;  %vm1220_vm9 = vcmask 1039360   ;;  %vm1412_vm10 = vcmask 908288  }
  0x52   : > { %320 = vrot.lane.b32.xlu0 %v2793_v3, %s2610_s26  ;;  %314 = vrot.lane.b32.xlu1 %v2795_v4, %s2610_s26  ;;  %vm2214_vm6 = vmneg %vm669_vm5  ;;  %v683_v38 = vld [vmem:[#allocation2 + $0x20] sm:$0xff]  ;;  %v875_v45 = vld [vmem:[#allocation2 + $0x30] sm:$0xff]  ;;  %vm1604_vm11 = vcmask 900096   ;;  %vm1796_vm12 = vcmask 891904   ;;  %s2036_s6 = scalar_lea.sflag [#allocation4], %s2774_s11  ;;  %p3116_p3 = scmp.ne.s32.totalorder %s3106_s14, 0 }
  0x53   : > { %v684_v47 = vld [vmem:[#allocation2 + $0x28] sm:$0xff]  ;;  %vm2895_vm8 = vmneg %vm861_vm7  ;;  %v876_v59 = vld [vmem:[#allocation2 + $0x38] sm:$0xff]  ;;  %s2620_s10 = smov [#allocation7]  }
  0x54   : > { %v1042_v62 = vld [vmem:[#allocation2 + $0x40] sm:$0xff]  ;;  %s2508_s28 = sshll.u32 %s2620_s10, 4  ;;  %s2509_s28 = int_to_ptr.vmem [resolvable:$false] %s2508_s28 }
  0x55   : > { %s2510_s29 = scalar_lea.vmem %s2509_s28, 1536 }
  0x56   : > { %322 = vrot.lane.b32.xlu0 %v2802_v6, %s2610_s26  ;;  %316 = vrot.lane.b32.xlu1 %v2804_v7, %s2610_s26  ;;  %s2989_s26 = scalar_lea.vmem [#allocation7], %s2777_s12 }
  0x5a   : > { %291 = vrot.lane.b32.xlu0 %v2785_v0, %s2612_s24  ;;  %293 = vrot.lane.b32.xlu1 %v2793_v3, %s2612_s24 }
  0x5e   : > { %295 = vrot.lane.b32.xlu0 %v2802_v6, %s2612_s24  ;;  %285 = vrot.lane.b32.xlu1 %v2787_v1, %s2612_s24 }
  0x62   : > { %287 = vrot.lane.b32.xlu0 %v2795_v4, %s2612_s24  ;;  %289 = vrot.lane.b32.xlu1 %v2804_v7, %s2612_s24  ;;  %s2055_s24 = sshll.u32 %s2989_s26, 4  ;;  %s3000_s24 = int_to_ptr.vmem [resolvable:$true] %s2055_s24 }
  0x63   : > { %s2504_s9 = scalar_lea.vmem %s3000_s24, 768  ;;  %p2511_p10 = scmp.lt.s32.totalorder %s3000_s24, %s2509_s28 }
  0x64   : > { %p2505_p8 = scmp.ne.s32.totalorder %s3000_s24, %s2504_s9  ;;  %p2512_p2 = scmp.lt.s32.totalorder %s2510_s29, %s2504_s9 }
  0x66   : > { %663 = vrot.lane.b32.xlu0 %v2785_v0, %s2613_s7  ;;  %665 = vrot.lane.b32.xlu1 %v2793_v3, %s2613_s7  ;;  %p2506_p11 = pnand %p2505_p8, %p3116_p3  ;;  %p2513_p13 = por %p2512_p2, %p2511_p10 }
  0x68   : > { %p2507_p12 = pneg %p2506_p11 }
  0x6a   : > { %657 = vrot.lane.b32.xlu0 %v2787_v1, %s2613_s7  ;;  %659 = vrot.lane.b32.xlu1 %v2795_v4, %s2613_s7  ;;  %p2514_p0 = pnand %p2513_p13, %p2507_p12 }
  0x6e   : > { %667 = vrot.lane.b32.xlu0 %v2802_v6, %s2613_s7  ;;  %661 = vrot.lane.b32.xlu1 %v2804_v7, %s2613_s7  ;;  %s2368_s7 = smul.u32 768, %s2675_s22 }
  0x70   : > { %s3020_s27 = scalar_lea.hbm %s3096_s5, %s2368_s7 }
  0x72   : > { %855 = vrot.lane.b32.xlu0 %v2785_v0, %s2614_s8  ;;  %857 = vrot.lane.b32.xlu1 %v2793_v3, %s2614_s8 }
  0x76   : > { %859 = vrot.lane.b32.xlu0 %v2802_v6, %s2614_s8  ;;  %849 = vrot.lane.b32.xlu1 %v2787_v1, %s2614_s8 }
  0x7a   : > { %851 = vrot.lane.b32.xlu0 %v2795_v4, %s2614_s8  ;;  %853 = vrot.lane.b32.xlu1 %v2804_v7, %s2614_s8  ;;  %s2996_s8 = scalar_lea.vmem [#allocation8], %s2777_s12 }
  0x7e   : > { %1216 = vrot.lane.b32.xlu0 %v2793_v3, %s2615_s16  ;;  %1218 = vrot.lane.b32.xlu1 %v2802_v6, %s2615_s16 }
  0x82   : > { %1214 = vrot.lane.b32.xlu0 %v2785_v0, %s2615_s16  ;;  %1210 = vrot.lane.b32.xlu1 %v2795_v4, %s2615_s16 }
  0x86   : > { %1212 = vrot.lane.b32.xlu0 %v2804_v7, %s2615_s16  ;;  %1208 = vrot.lane.b32.xlu1 %v2787_v1, %s2615_s16  ;;  %s2072_s16 = sshll.u32 %s2996_s8, 4  ;;  %s3013_s16 = int_to_ptr.vmem [resolvable:$true] %s2072_s16 }
  0x8a   : > { %1408 = vrot.lane.b32.xlu0 %v2793_v3, %s2616_s23  ;;  %1410 = vrot.lane.b32.xlu1 %v2802_v6, %s2616_s23 }
  0x8e   : > { %1406 = vrot.lane.b32.xlu0 %v2785_v0, %s2616_s23  ;;  %1402 = vrot.lane.b32.xlu1 %v2795_v4, %s2616_s23 }
  0x92   : > { %1404 = vrot.lane.b32.xlu0 %v2804_v7, %s2616_s23  ;;  %1400 = vrot.lane.b32.xlu1 %v2787_v1, %s2616_s23  ;;  %s3011_s23 = scalar_lea.hbm %s3095_s4, %s2368_s7 }
  0x96   : > { %1600 = vrot.lane.b32.xlu0 %v2793_v3, %s2617_s15  ;;  %1602 = vrot.lane.b32.xlu1 %v2802_v6, %s2617_s15 }
  0x9a   : > { %1598 = vrot.lane.b32.xlu0 %v2785_v0, %s2617_s15  ;;  %1594 = vrot.lane.b32.xlu1 %v2795_v4, %s2617_s15 }
  0x9e   : > { %1596 = vrot.lane.b32.xlu0 %v2804_v7, %s2617_s15  ;;  %1592 = vrot.lane.b32.xlu1 %v2787_v1, %s2617_s15 }
  0xa2   : > { %1792 = vrot.lane.b32.xlu0 %v2793_v3, %s2618_s17  ;;  %1794 = vrot.lane.b32.xlu1 %v2802_v6, %s2618_s17 }
  0xa6   : > { %1790 = vrot.lane.b32.xlu0 %v2785_v0, %s2618_s17  ;;  %1786 = vrot.lane.b32.xlu1 %v2795_v4, %s2618_s17 }
  0xaa   : > { %1788 = vrot.lane.b32.xlu0 %v2804_v7, %s2618_s17  ;;  %1784 = vrot.lane.b32.xlu1 %v2787_v1, %s2618_s17 }
  0xae   : > { %1985 = vperm.xlu1 %2449, %v1977_v9   ;;  %1980 = vperm.xlu0 %2448, %v1976_v10   ;;  %v1234_v9 = vld [vmem:[#allocation2 + $0x50] sm:$0xff]  ;;  %v1235_v10 = vld [vmem:[#allocation2 + $0x58] sm:$0xff] }
  0xc0   : > { %v319_v11 = vpop.permute.xlu0 %318  ;;  %v313_v12 = vpop.permute.xlu1 %312 }
  0xc4   : > { %v321_v13 = vpop.permute.xlu0 %320  ;;  %v315_v14 = vpop.permute.xlu1 %314 }
  0xc5   : > { %v327_v15 = vsel %vm324_vm1, %v319_v11, %v321_v13  ;;  %v325_v16 = vsel %vm324_vm1, %v313_v12, %v315_v14 }
  0xc6   : > { %375 = vmatprep.subr.mxu0 %v327_v15 }
  0xc7   : > { %2199 = vmatpush1.msk.msra.mxu0 %vm2198_vm2, %v319_v11 }
  0xc8   : > { %v323_v17 = vpop.permute.xlu0 %322  ;;  %377 = vmatprep.subr.mxu0 %v325_v16  ;;  %v317_v18 = vpop.permute.xlu1 %316  ;;  %v1426_v16 = vld [vmem:[#allocation2 + $0x60] sm:$0xff] }
  0xc9   : > { %2201 = vmatpush1.msk.msra.mxu0 %vm2198_vm2, %v313_v12  ;;  %v328_v19 = vsel %vm324_vm1, %v321_v13, %v323_v17  ;;  %v326_v20 = vsel %vm324_vm1, %v315_v14, %v317_v18 }
  0xca   : > { %2302 = vmatprep.subr.mxu1 %v328_v19  ;;  %2202 = vmatmul.mubr.msk.f32.vlgmr.msra.gmra.mxu0 %vm340_vm0, %v2791_v2 }
  0xcb   : > { %2303 = vmatpush3.msra.mxu1 %v328_v19  ;;  %417 = vmatprep.mubr.f32.mxu0 %v2611_v5 }
  0xcc   : > { %v292_v22 = vpop.permute.xlu0 %291  ;;  %2304 = vmatprep.subr.mxu1 %v326_v20  ;;  %v294_v23 = vpop.permute.xlu1 %293 }
  0xcd   : > { %2305 = vmatpush3.msra.mxu1 %v326_v20  ;;  %v300_v25 = vsel %vm297_vm3, %v292_v22, %v294_v23  ;;  %v1427_v20 = vld [vmem:[#allocation2 + $0x68] sm:$0xff] }
  0xce   : > { %533 = vmatprep.subr.mxu1 %v300_v25  ;;  %2307 = vmatmul.mubr.msk.f32.vlgmr.msra.gmra.mxu1 %vm340_vm0, %v339_v21 }
  0xcf   : > { %2207 = vmatpush1.msk.msra.mxu1 %vm2865_vm4, %v292_v22  ;;  %2203 = vmatmul.mubr.msk.f32.gmra.mxu0 %vm340_vm0, %v339_v21 }
  0xd0   : > { %v296_v27 = vpop.permute.xlu0 %295  ;;  %v286_v28 = vpop.permute.xlu1 %285  ;;  %2313 = vmatprep.mubr.msk.f32.mxu0 %vm340_vm0, %v310_v26  ;;  %569 = vmatprep.mubr.f32.mxu1 %v2611_v5 }
  0xd1   : > { %v301_v29 = vsel %vm297_vm3, %v294_v23, %v296_v27 }
  0xd2   : > { %2309 = vmatprep.subr.mxu0 %v301_v29 }
  0xd3   : > { %2310 = vmatpush3.msra.mxu0 %v301_v29 }
  0xd4   : > { %v288_v30 = vpop.permute.xlu0 %287  ;;  %v290_v31 = vpop.permute.xlu1 %289 }
  0xd5   : > { %v298_v32 = vsel %vm297_vm3, %v286_v28, %v288_v30  ;;  %v299_v33 = vsel %vm297_vm3, %v288_v30, %v290_v31 }
  0xd6   : > { %535 = vmatprep.subr.mxu1 %v298_v32  ;;  %2311 = vmatprep.subr.mxu0 %v299_v33  ;;  %v1619_v32 = vld [vmem:[#allocation2 + $0x78] sm:$0xff] }
  0xd7   : > { %2209 = vmatpush1.msk.msra.mxu1 %vm2865_vm4, %v286_v28  ;;  %2312 = vmatpush3.msra.mxu0 %v299_v33 }
  0xd8   : > { %v664_v35 = vpop.permute.xlu0 %663  ;;  %v666_v36 = vpop.permute.xlu1 %665  ;;  %2314 = vmatmul.mubr.msk.f32.vlgmr.msra.gmra.mxu0 %vm340_vm0, %v311_v34  ;;  %2210 = vmatmul.mubr.msk.f32.vlgmr.msra.gmra.mxu1 %vm340_vm0, %v310_v26  ;;  %v1618_v26 = vld [vmem:[#allocation2 + $0x70] sm:$0xff] }
  0xd9   : > { %v672_v37 = vsel %vm669_vm5, %v664_v35, %v666_v36  ;;  %575 = vmatprep.mubr.f32.mxu1 %v2611_v5  ;;  %755 = vmatprep.mubr.f32.mxu0 %v2611_v5 }
  0xda   : > { %719 = vmatprep.subr.mxu0 %v672_v37 }
  0xdb   : > { %2215 = vmatpush1.msk.msra.mxu0 %vm2214_vm6, %v664_v35 }
  0xdc   : > { %v658_v39 = vpop.permute.xlu0 %657  ;;  %v660_v40 = vpop.permute.xlu1 %659  ;;  %2211 = vmatmul.mubr.msk.f32.gmra.mxu1 %vm340_vm0, %v311_v34 }
  0xdd   : > { %v670_v41 = vsel %vm669_vm5, %v658_v39, %v660_v40  ;;  %2320 = vmatprep.mubr.msk.f32.mxu1 %vm340_vm0, %v683_v38 }
  0xde   : > { %721 = vmatprep.subr.mxu0 %v670_v41 }
  0xdf   : > { %2217 = vmatpush1.msk.msra.mxu0 %vm2214_vm6, %v658_v39 }
  0xe0   : > { %v668_v42 = vpop.permute.xlu0 %667  ;;  %v662_v43 = vpop.permute.xlu1 %661  ;;  %2218 = vmatmul.mubr.msk.f32.vlgmr.msra.gmra.mxu0 %vm340_vm0, %v683_v38  ;;  %v1810_v38 = vld [vmem:[#allocation2 + $0x80] sm:$0xff] }
  0xe1   : > { %v673_v44 = vsel %vm669_vm5, %v666_v36, %v668_v42  ;;  %761 = vmatprep.mubr.f32.mxu0 %v2611_v5  ;;  %v671_v46 = vsel %vm669_vm5, %v660_v40, %v662_v43 }
  0xe2   : > { %2316 = vmatprep.subr.mxu1 %v673_v44 }
  0xe3   : > { %2317 = vmatpush3.msra.mxu1 %v673_v44  ;;  %v1811_v44 = vld [vmem:[#allocation2 + $0x88] sm:$0xff] }
  0xe4   : > { %v856_v48 = vpop.permute.xlu0 %855  ;;  %2318 = vmatprep.subr.mxu1 %v671_v46  ;;  %v858_v49 = vpop.permute.xlu1 %857  ;;  %2219 = vmatmul.mubr.msk.f32.gmra.mxu0 %vm340_vm0, %v684_v47 }
  0xe5   : > { %2319 = vmatpush3.msra.mxu1 %v671_v46  ;;  %v864_v51 = vsel %vm861_vm7, %v856_v48, %v858_v49  ;;  %2327 = vmatprep.mubr.msk.f32.mxu0 %vm340_vm0, %v875_v45 }
  0xe6   : > { %911 = vmatprep.subr.mxu1 %v864_v51  ;;  %2321 = vmatmul.mubr.msk.f32.vlgmr.msra.gmra.mxu1 %vm340_vm0, %v684_v47 }
  0xe7   : > { %2223 = vmatpush1.msk.msra.mxu1 %vm2895_vm8, %v856_v48  ;;  %947 = vmatprep.mubr.f32.mxu1 %v2611_v5 }
  0xe8   : > { %v860_v52 = vpop.permute.xlu0 %859  ;;  %v850_v53 = vpop.permute.xlu1 %849 }
  0xe9   : > { %v865_v54 = vsel %vm861_vm7, %v858_v49, %v860_v52 }
  0xea   : > { %2323 = vmatprep.subr.mxu0 %v865_v54 }
  0xeb   : > { %2324 = vmatpush3.msra.mxu0 %v865_v54 }
  0xec   : > { %v852_v55 = vpop.permute.xlu0 %851  ;;  %v854_v56 = vpop.permute.xlu1 %853 }
  0xed   : > { %v862_v57 = vsel %vm861_vm7, %v850_v53, %v852_v55  ;;  %v863_v58 = vsel %vm861_vm7, %v852_v55, %v854_v56 }
  0xee   : > { %913 = vmatprep.subr.mxu1 %v862_v57  ;;  %2325 = vmatprep.subr.mxu0 %v863_v58 }
  0xef   : > { %2225 = vmatpush1.msk.msra.mxu1 %vm2895_vm8, %v850_v53  ;;  %2326 = vmatpush3.msra.mxu0 %v863_v58 }
  0xf0   : > { %v1217_v60 = vpop.permute.xlu0 %1216  ;;  %2226 = vmatmul.mubr.msk.f32.vlgmr.msra.gmra.mxu1 %vm340_vm0, %v875_v45  ;;  %2328 = vmatmul.mubr.msk.f32.vlgmr.msra.gmra.mxu0 %vm340_vm0, %v876_v59  ;;  %v1219_v61 = vpop.permute.xlu1 %1218 }
  0xf1   : > { %1078 = vmatprep.subr.mxu0 %v2793_v3  ;;  %2330 = vmatprep.subr.mxu1 %v2802_v6  ;;  %v1043_v3 = vld [vmem:[#allocation2 + $0x48] sm:$0xff] }
  0xf2   : > { %1079 = vmatpush1.msra.mxu0 %v2785_v0  ;;  %2331 = vmatpush3.msra.mxu1 %v2802_v6  ;;  %v1224_v0 = vsel %vm1220_vm9, %v1217_v60, %v1219_v61 }
  0xf3   : > { %1080 = vmatprep.subr.mxu0 %v2795_v4  ;;  %2332 = vmatprep.subr.mxu1 %v2804_v7 }
  0xf4   : > { %953 = vmatprep.mubr.f32.mxu1 %v2611_v5  ;;  %1081 = vmatpush1.msra.mxu0 %v2787_v1  ;;  %v1215_v63 = vpop.permute.xlu0 %1214  ;;  %v1211_v2 = vpop.permute.xlu1 %1210 }
  0xf5   : > { %1114 = vmatprep.mubr.f32.mxu0 %v2611_v5  ;;  %2333 = vmatpush3.msra.mxu1 %v2804_v7  ;;  %v1223_v7 = vsel %vm1220_vm9, %v1215_v63, %v1217_v60 }
  0xf6   : > { %2227 = vmatmul.mubr.msk.f32.gmra.mxu1 %vm340_vm0, %v876_v59  ;;  %2230 = vmatmul.mubr.msk.f32.vlgmr.msra.gmra.mxu0 %vm340_vm0, %v1042_v62 }
  0xf7   : > { %1270 = vmatprep.subr.mxu1 %v1224_v0  ;;  %2337 = vmatprep.subr.msk.mxu0 %vm1220_vm9, %v1219_v61 }
  0xf8   : > { %2338 = vmatpush3.msk.msra.mxu0 %vm1220_vm9, %v1219_v61  ;;  %1120 = vmatprep.mubr.f32.mxu0 %v2611_v5  ;;  %v1213_v1 = vpop.permute.xlu0 %1212  ;;  %v1209_v4 = vpop.permute.xlu1 %1208 }
  0xf9   : > { %2334 = vmatprep.mubr.msk.f32.mxu1 %vm340_vm0, %v1042_v62  ;;  %2339 = vmatprep.subr.msk.mxu0 %vm1220_vm9, %v1213_v1  ;;  %v1222_v6 = vsel %vm1220_vm9, %v1211_v2, %v1213_v1  ;;  %v1221_v8 = vsel %vm1220_vm9, %v1209_v4, %v1211_v2 }
  0xfa   : > { %2231 = vmatmul.mubr.msk.f32.gmra.mxu0 %vm340_vm0, %v1043_v3  ;;  %2335 = vmatmul.mubr.msk.f32.vlgmr.msra.gmra.mxu1 %vm340_vm0, %v1043_v3 }
  0xfb   : > { %1271 = vmatpush1.msra.mxu1 %v1223_v7  ;;  %2340 = vmatpush3.msk.msra.mxu0 %vm1220_vm9, %v1213_v1 }
  0xfc   : > { %1272 = vmatprep.subr.mxu1 %v1222_v6  ;;  %1306 = vmatprep.mubr.f32.mxu1 %v2611_v5  ;;  %v1409_v11 = vpop.permute.xlu0 %1408  ;;  %v1411_v12 = vpop.permute.xlu1 %1410 }
  0xfd   : > { %1273 = vmatpush1.msra.mxu1 %v1221_v8  ;;  %2341 = vmatprep.mubr.msk.f32.mxu0 %vm340_vm0, %v1234_v9  ;;  %v1416_v13 = vsel %vm1412_vm10, %v1409_v11, %v1411_v12 }
  0xfe   : > { %2234 = vmatmul.mubr.msk.f32.vlgmr.msra.gmra.mxu1 %vm340_vm0, %v1234_v9  ;;  %2342 = vmatmul.mubr.msk.f32.vlgmr.msra.gmra.mxu0 %vm340_vm0, %v1235_v10 }
  0xff   : > { %2344 = vmatprep.subr.msk.mxu1 %vm1412_vm10, %v1411_v12  ;;  %1462 = vmatprep.subr.mxu0 %v1416_v13 }
 0x100   : > { %2345 = vmatpush3.msk.msra.mxu1 %vm1412_vm10, %v1411_v12  ;;  %1312 = vmatprep.mubr.f32.mxu1 %v2611_v5  ;;  %v1407_v14 = vpop.permute.xlu0 %1406  ;;  %v1403_v15 = vpop.permute.xlu1 %1402 }
 0x101   : > { %v1415_v17 = vsel %vm1412_vm10, %v1407_v14, %v1409_v11  ;;  %1498 = vmatprep.mubr.f32.mxu0 %v2611_v5 }
 0x102   : > { %2235 = vmatmul.mubr.msk.f32.gmra.mxu1 %vm340_vm0, %v1235_v10  ;;  %1463 = vmatpush1.msra.mxu0 %v1415_v17 }
 0x103   : > { %2348 = vmatprep.mubr.msk.f32.mxu1 %vm340_vm0, %v1426_v16 }
 0x104   : > { %v1405_v18 = vpop.permute.xlu0 %1404  ;;  %v1401_v19 = vpop.permute.xlu1 %1400 }
 0x105   : > { %v1413_v21 = vsel %vm1412_vm10, %v1401_v19, %v1403_v15  ;;  %2346 = vmatprep.subr.msk.mxu1 %vm1412_vm10, %v1405_v18  ;;  %v1414_v22 = vsel %vm1412_vm10, %v1403_v15, %v1405_v18 }
 0x106   : > { %1464 = vmatprep.subr.mxu0 %v1414_v22  ;;  %2347 = vmatpush3.msk.msra.mxu1 %vm1412_vm10, %v1405_v18 }
 0x107   : > { %1465 = vmatpush1.msra.mxu0 %v1413_v21  ;;  %2349 = vmatmul.mubr.msk.f32.vlgmr.msra.gmra.mxu1 %vm340_vm0, %v1427_v20 }
 0x108   : > { %v1601_v23 = vpop.permute.xlu0 %1600  ;;  %2240 = vmatmul.mubr.msk.f32.vlgmr.msra.gmra.mxu0 %vm340_vm0, %v1426_v16  ;;  %v1603_v24 = vpop.permute.xlu1 %1602  ;;  %1690 = vmatprep.mubr.f32.mxu1 %v2611_v5 }
 0x109   : > { %2351 = vmatprep.subr.msk.mxu0 %vm1604_vm11, %v1603_v24  ;;  %v1608_v25 = vsel %vm1604_vm11, %v1601_v23, %v1603_v24  ;;  %1504 = vmatprep.mubr.f32.mxu0 %v2611_v5 }
 0x10a   : > { %1654 = vmatprep.subr.mxu1 %v1608_v25  ;;  %2352 = vmatpush3.msk.msra.mxu0 %vm1604_vm11, %v1603_v24 }
 0x10c   : > { %v1599_v27 = vpop.permute.xlu0 %1598  ;;  %2241 = vmatmul.mubr.msk.f32.gmra.mxu0 %vm340_vm0, %v1427_v20  ;;  %v1595_v28 = vpop.permute.xlu1 %1594 }
 0x10d   : > { %v1607_v29 = vsel %vm1604_vm11, %v1599_v27, %v1601_v23  ;;  %2355 = vmatprep.mubr.msk.f32.mxu0 %vm340_vm0, %v1618_v26 }
 0x10e   : > { %1655 = vmatpush1.msra.mxu1 %v1607_v29 }
 0x110   : > { %v1597_v30 = vpop.permute.xlu0 %1596  ;;  %v1593_v31 = vpop.permute.xlu1 %1592 }
 0x111   : > { %v1605_v33 = vsel %vm1604_vm11, %v1593_v31, %v1595_v28  ;;  %2353 = vmatprep.subr.msk.mxu0 %vm1604_vm11, %v1597_v30  ;;  %v1606_v34 = vsel %vm1604_vm11, %v1595_v28, %v1597_v30 }
 0x112   : > { %1656 = vmatprep.subr.mxu1 %v1606_v34  ;;  %2354 = vmatpush3.msk.msra.mxu0 %vm1604_vm11, %v1597_v30 }
 0x113   : > { %1657 = vmatpush1.msra.mxu1 %v1605_v33  ;;  %2356 = vmatmul.mubr.msk.f32.vlgmr.msra.gmra.mxu0 %vm340_vm0, %v1619_v32 }
 0x114   : > { %v1793_v35 = vpop.permute.xlu0 %1792  ;;  %2246 = vmatmul.mubr.msk.f32.vlgmr.msra.gmra.mxu1 %vm340_vm0, %v1618_v26  ;;  %v1795_v36 = vpop.permute.xlu1 %1794  ;;  %1882 = vmatprep.mubr.f32.mxu0 %v2611_v5 }
 0x115   : > { %2358 = vmatprep.subr.msk.mxu1 %vm1796_vm12, %v1795_v36  ;;  %v1800_v37 = vsel %vm1796_vm12, %v1793_v35, %v1795_v36  ;;  %1696 = vmatprep.mubr.f32.mxu1 %v2611_v5 }
 0x116   : > { %1846 = vmatprep.subr.mxu0 %v1800_v37  ;;  %2359 = vmatpush3.msk.msra.mxu1 %vm1796_vm12, %v1795_v36  ;;  %v1996_v36 = vlaneseq }
 0x118   : > { %v1791_v39 = vpop.permute.xlu0 %1790  ;;  %2247 = vmatmul.mubr.msk.f32.gmra.mxu1 %vm340_vm0, %v1619_v32  ;;  %v1787_v40 = vpop.permute.xlu1 %1786 }
 0x119   : > { %v1799_v41 = vsel %vm1796_vm12, %v1791_v39, %v1793_v35  ;;  %2362 = vmatprep.mubr.msk.f32.mxu1 %vm340_vm0, %v1810_v38 }
 0x11a   : > { %1847 = vmatpush1.msra.mxu0 %v1799_v41 }
 0x11c   : > { %v1789_v42 = vpop.permute.xlu0 %1788  ;;  %v1785_v43 = vpop.permute.xlu1 %1784 }
 0x11d   : > { %v1797_v45 = vsel %vm1796_vm12, %v1785_v43, %v1787_v40  ;;  %2360 = vmatprep.subr.msk.mxu1 %vm1796_vm12, %v1789_v42  ;;  %v1798_v46 = vsel %vm1796_vm12, %v1787_v40, %v1789_v42 }
 0x11e   : > { %1848 = vmatprep.subr.mxu0 %v1798_v46  ;;  %2361 = vmatpush3.msk.msra.mxu1 %vm1796_vm12, %v1789_v42 }
 0x11f   : > { %1849 = vmatpush1.msra.mxu0 %v1797_v45  ;;  %2363 = vmatmul.mubr.msk.f32.vlgmr.msra.gmra.mxu1 %vm340_vm0, %v1811_v44  ;;  %v1997_v45 = vshrl.u32 %v1996_v36, 7 }
 0x120   : > { %2252 = vmatmul.mubr.msk.f32.vlgmr.msra.gmra.mxu0 %vm340_vm0, %v1810_v38 }
 0x121   : > { %1888 = vmatprep.mubr.f32.mxu0 %v2611_v5 }
 0x124   : > { %2253 = vmatmul.mubr.msk.f32.gmra.mxu0 %vm340_vm0, %v1811_v44 }
 0x18a   : > { %v413_v47 = vpop.f32.mrf.mxu0 }
 0x18c   : > { %v415_v48 = vpop.f32.mrf.mxu0 }
 0x18e   : > { %v2308_v50 = vpop.f32.mrf.mxu1 }
 0x18f   : > { %v419_v49 = vpop.f32.mrf.mxu0 }
 0x190   : > { %v490_v52 = vpop.f32.mrf.mxu1 }
 0x191   : > { %v421_v51 = vpop.f32.mrf.mxu0 }
 0x198   : > { %v571_v53 = vpop.f32.mrf.mxu1  ;;  %v2315_v54 = vpop.f32.mrf.mxu0 }
 0x199   : > { %v654_v18 = vadd.f32 %v2315_v54, %v2308_v50  ;;  %v572_v21 = vadd.f32 %v571_v53, %v413_v47 }
 0x19a   : > { %v573_v55 = vpop.f32.mrf.mxu1  ;;  %v648_v56 = vpop.f32.mrf.mxu0 }
 0x19b   : > { %v649_v22 = vadd.f32 %v648_v56, %v490_v52  ;;  %v574_v25 = vadd.f32 %v573_v55, %v415_v48 }
 0x19c   : > { %v577_v57 = vpop.f32.mrf.mxu1 }
 0x19d   : > { %v578_v27 = vadd.f32 %v577_v57, %v419_v49  ;;  %v2006_v57 = vsub.s32 2, %v1997_v45 }
 0x19e   : > { %v579_v59 = vpop.f32.mrf.mxu1 }
 0x19f   : > { %v580_v32 = vadd.f32 %v579_v59, %v421_v51 }
 0x1a0   : > { %v757_v58 = vpop.f32.mrf.mxu0 }
 0x1a1   : > { %v843_v28 = vadd.f32 %v757_v58, %v572_v21  ;;  %v1998_v58 = vsub.s32 0, %v1997_v45 }
 0x1a2   : > { %v759_v60 = vpop.f32.mrf.mxu0 }
 0x1a3   : > { %v844_v33 = vadd.f32 %v759_v60, %v574_v25 }
 0x1a4   : > { %v763_v61 = vpop.f32.mrf.mxu0 }
 0x1a5   : > { %v846_v37 = vadd.f32 %v763_v61, %v578_v27 }
 0x1a6   : > { %v2322_v62 = vpop.f32.mrf.mxu1  ;;  %v765_v63 = vpop.f32.mrf.mxu0 }
 0x1a7   : > { %v848_v23 = vadd.f32 %v2322_v62, %v654_v18  ;;  %v847_v42 = vadd.f32 %v765_v63, %v580_v32 }
 0x1a8   : > { %v834_v5 = vpop.f32.mrf.mxu1 }
 0x1a9   : > { %v845_v29 = vadd.f32 %v834_v5, %v649_v22  ;;  %v1994_v5 = vld [vmem:[%s3093_s2] sm:$0x7] }
 0x1b0   : > { %v949_v2 = vpop.f32.mrf.mxu1  ;;  %v2329_v0 = vpop.f32.mrf.mxu0 }
 0x1b1   : > { %v1040_v30 = vadd.f32 %v2329_v0, %v848_v23  ;;  %v1035_v38 = vadd.f32 %v949_v2, %v843_v28 }
 0x1b2   : > { %v951_v3 = vpop.f32.mrf.mxu1  ;;  %v1026_v1 = vpop.f32.mrf.mxu0 }
 0x1b3   : > { %v1037_v39 = vadd.f32 %v1026_v1, %v845_v29  ;;  %v1036_v43 = vadd.f32 %v951_v3, %v844_v33  ;;  %v2002_v3 = vsub.s32 1, %v1997_v45 }
 0x1b6   : > { %v955_v4 = vpop.f32.mrf.mxu1  ;;  %v1116_v6 = vpop.f32.mrf.mxu0 }
 0x1b7   : > { %v1038_v46 = vadd.f32 %v955_v4, %v846_v37  ;;  %v1202_v47 = vadd.f32 %v1116_v6, %v1035_v38 }
 0x1b8   : > { %v957_v7 = vpop.f32.mrf.mxu1  ;;  %v1118_v8 = vpop.f32.mrf.mxu0 }
 0x1b9   : > { %v1039_v51 = vadd.f32 %v957_v7, %v847_v42  ;;  %v1203_v53 = vadd.f32 %v1118_v8, %v1036_v43 }
 0x1ba   : > { %v2336_v9 = vpop.f32.mrf.mxu1  ;;  %v1122_v11 = vpop.f32.mrf.mxu0 }
 0x1bb   : > { %v1207_v40 = vadd.f32 %v2336_v9, %v1040_v30  ;;  %v1205_v59 = vadd.f32 %v1122_v11, %v1038_v46  ;;  %v1986_v9 = vpop.permute.xlu1 %1985 }
 0x1bc   : > { %v1193_v10 = vpop.f32.mrf.mxu1  ;;  %v1124_v13 = vpop.f32.mrf.mxu0 }
 0x1bd   : > { %v1204_v50 = vadd.f32 %v1193_v10, %v1037_v39  ;;  %v1206_v1 = vadd.f32 %v1124_v13, %v1039_v51 }
 0x1be   : > { %v1308_v12 = vpop.f32.mrf.mxu1  ;;  %v2343_v15 = vpop.f32.mrf.mxu0 }
 0x1bf   : > { %v1399_v52 = vadd.f32 %v2343_v15, %v1207_v40  ;;  %v1394_v54 = vadd.f32 %v1308_v12, %v1202_v47  ;;  %v1999_v15 = vrot.slane %v1994_v5, %v1998_v58 }
 0x1c0   : > { %v1310_v14 = vpop.f32.mrf.mxu1  ;;  %v1385_v17 = vpop.f32.mrf.mxu0 }
 0x1c1   : > { %v1396_v55 = vadd.f32 %v1385_v17, %v1204_v50  ;;  %v1395_v60 = vadd.f32 %v1310_v14, %v1203_v53  ;;  %v2007_v14 = vrot.slane %v1994_v5, %v2006_v57  ;;  %v1981_v17 = vpop.permute.xlu0 %1980 }
 0x1c2   : > { %v1314_v16 = vpop.f32.mrf.mxu1 }
 0x1c3   : > { %v1397_v4 = vadd.f32 %v1314_v16, %v1205_v59  ;;  %v2003_v16 = vrot.slane %v1994_v5, %v2002_v3 }
 0x1c4   : > { %v1316_v20 = vpop.f32.mrf.mxu1 }
 0x1c5   : > { %v1398_v18 = vadd.f32 %v1316_v20, %v1206_v1 }
 0x1c7   : > { %v2350_v24 = vpop.f32.mrf.mxu1 }
 0x1c8   : > { %v1500_v19 = vpop.f32.mrf.mxu0  ;;  %v1591_v56 = vadd.f32 %v2350_v24, %v1399_v52 }
 0x1c9   : > { %v1577_v31 = vpop.f32.mrf.mxu1  ;;  %v1586_v61 = vadd.f32 %v1500_v19, %v1394_v54 }
 0x1ca   : > { %v1502_v26 = vpop.f32.mrf.mxu0  ;;  %v1588_v2 = vadd.f32 %v1577_v31, %v1396_v55 }
 0x1cb   : > { %v1587_v6 = vadd.f32 %v1502_v26, %v1395_v60 }
 0x1cc   : > { %v1506_v34 = vpop.f32.mrf.mxu0 }
 0x1cd   : > { %v1589_v19 = vadd.f32 %v1506_v34, %v1397_v4 }
 0x1ce   : > { %v1508_v44 = vpop.f32.mrf.mxu0 }
 0x1cf   : > { %v1590_v26 = vadd.f32 %v1508_v44, %v1398_v18 }
 0x1d3   : > { %v2357_v48 = vpop.f32.mrf.mxu0 }
 0x1d4   : > { %v1692_v35 = vpop.f32.mrf.mxu1  ;;  %v1783_v0 = vadd.f32 %v2357_v48, %v1591_v56 }
 0x1d5   : > { %v1769_v62 = vpop.f32.mrf.mxu0  ;;  %v1778_v7 = vadd.f32 %v1692_v35, %v1586_v61 }
 0x1d6   : > { %v1694_v41 = vpop.f32.mrf.mxu1  ;;  %v1780_v10 = vadd.f32 %v1769_v62, %v1588_v2 }
 0x1d7   : > { %v1779_v21 = vadd.f32 %v1694_v41, %v1587_v6 }
 0x1d8   : > { %v1698_v49 = vpop.f32.mrf.mxu1 }
 0x1d9   : > { %v1781_v27 = vadd.f32 %v1698_v49, %v1589_v19 }
 0x1da   : > { %v1700_v63 = vpop.f32.mrf.mxu1 }
 0x1db   : > { %v1782_v33 = vadd.f32 %v1700_v63, %v1590_v26 }
 0x1df   : > { %v2364_v8 = vpop.f32.mrf.mxu1 }
 0x1e0   : > { %v1975_v12 = vadd.f32 %v2364_v8, %v1783_v0  ;;  %v1884_v11 = vpop.f32.mrf.mxu0 }
 0x1e1   : > { %v1970_v22 = vadd.f32 %v1884_v11, %v1778_v7  ;;  %v1961_v23 = vpop.f32.mrf.mxu1 }
 0x1e2   : > { %v1972_v24 = vadd.f32 %v1961_v23, %v1780_v10  ;;  %v1993_v25 = vadd.f32 %v1986_v9, %v1975_v12  ;;  %v1886_v13 = vpop.f32.mrf.mxu0 }
 0x1e3   : > { %v1988_v28 = vadd.f32 %v1981_v17, %v1970_v22  ;;  %v1971_v29 = vadd.f32 %v1886_v13, %v1779_v21 }
 0x1e4   : > { %v2016_v30 = vmul.f32 %v2007_v14, %v1993_v25  ;;  %v1990_v31 = vadd.f32 %v1981_v17, %v1972_v24  ;;  %v1890_v32 = vpop.f32.mrf.mxu0 }
 0x1e5   : > { %v2011_v20 = vmul.f32 %v1999_v15, %v1988_v28  ;;  %v1989_v34 = vadd.f32 %v1981_v17, %v1971_v29  ;;  %v1973_v35 = vadd.f32 %v1890_v32, %v1781_v27 }
 0x1e6   : > { %2022 = vst [vmem:[%s2989_s26 + $0x28] sm:$0xff] %v2016_v30  ;;  %v2028_v36 = vmax.f32 %v2016_v30, 0.0  ;;  %v2013_v37 = vmul.f32 %v2007_v14, %v1990_v31  ;;  %v1892_v38 = vpop.f32.mrf.mxu0 }
 0x1e7   : > { %2017 = vst [vmem:[%s2989_s26] sm:$0xff] %v2011_v20  ;;  %v2023_v39 = vmax.f32 %v2011_v20, 0.0  ;;  %v2012_v40 = vmul.f32 %v2003_v16, %v1989_v34  ;;  %v1991_v41 = vadd.f32 %v1986_v9, %v1973_v35  ;;  %v1974_v42 = vadd.f32 %v1892_v38, %v1782_v33 }
 0x1e8   : > { %2034 = vst [vmem:[%s2996_s8 + $0x28] sm:$0xff] %v2028_v36  ;;  %2019 = vst [vmem:[%s2989_s26 + $0x10] sm:$0xff] %v2013_v37  ;;  %v2025_v43 = vmax.f32 %v2013_v37, 0.0 }
 0x1e9   : > { %2029 = vst [vmem:[%s2996_s8] sm:$0xff] %v2023_v39  ;;  %2018 = vst [vmem:[%s2989_s26 + $0x8] sm:$0xff] %v2012_v40  ;;  %v2024_v44 = vmax.f32 %v2012_v40, 0.0  ;;  %v2014_v45 = vmul.f32 %v1999_v15, %v1991_v41  ;;  %v1992_v46 = vadd.f32 %v1986_v9, %v1974_v42 }
 0x1ea   : > { %2031 = vst [vmem:[%s2996_s8 + $0x10] sm:$0xff] %v2025_v43 }
 0x1eb   : > { %2030 = vst [vmem:[%s2996_s8 + $0x8] sm:$0xff] %v2024_v44  ;;  %2020 = vst [vmem:[%s2989_s26 + $0x18] sm:$0xff] %v2014_v45  ;;  %v2026_v47 = vmax.f32 %v2014_v45, 0.0  ;;  %v2015_v48 = vmul.f32 %v2003_v16, %v1992_v46 }
 0x1ed   : > { %2032 = vst [vmem:[%s2996_s8 + $0x18] sm:$0xff] %v2026_v47  ;;  %2021 = vst [vmem:[%s2989_s26 + $0x20] sm:$0xff] %v2015_v48  ;;  %v2027_v49 = vmax.f32 %v2015_v48, 0.0 }
 0x1ee   : > { %2517 = shalt.err (!%p2514_p0)
}
 0x1ef   : > { %s2518_s26 = scalar_lea.hbm %s3011_s23, 768  ;;  %s2522_s12 = scalar_lea.hbm %s3095_s4, 1536 }
 0x1f0   : > { %p2519_p5 = scmp.ne.s32.totalorder %s3011_s23, %s2518_s26  ;;  %p2523_p6 = scmp.lt.s32.totalorder %s3011_s23, %s3095_s4 }
 0x1f1   : > { %p2524_p7 = scmp.lt.s32.totalorder %s2522_s12, %s2518_s26 }
 0x1f2   : > { %p2520_p9 = pnand %p2519_p5, %p3116_p3 }
 0x1f3   : > { %p2525_p4 = por %p2524_p7, %p2523_p6 }
 0x1f4   : > { %p2521_p1 = pneg %p2520_p9 }
 0x1f6   : > { %p2526_p8 = pnand %p2525_p4, %p2521_p1 }
 0x1f8   : > { %2529 = shalt.err (!%p2526_p8)
}
 0x1f9   : > { %s2621_s9 = smov 384   ;;  %s2622_s10 = smov 24   ;;  %2033 = vst [vmem:[%s2996_s8 + $0x20] sm:$0xff] %v2027_v49 }
 0x1fa   : > { %2376 = dma.vmem_to_hbm [thread:$0]  (%p3116_p3), %s3000_s24, 768, %s3011_s23, %s2036_s6, %s2621_s9, %s2621_s9, %s2622_s10  }
 0x1fb   : > { %s2041_s28 = scalar_lea.sflag [#allocation9], %s2774_s11  ;;  %s2530_s29 = scalar_lea.vmem %s3013_s16, 768 }
 0x1fc   : > { %p2531_p11 = scmp.ne.s32.totalorder %s3013_s16, %s2530_s29  ;;  %s2623_s26 = smov [#allocation8]  }
 0x1fd   : > { %s2534_s7 = sshll.u32 %s2623_s26, 4  ;;  %s2535_s7 = int_to_ptr.vmem [resolvable:$false] %s2534_s7 }
 0x1fe   : > { %p2532_p12 = pnand %p2531_p11, %p3116_p3  ;;  %s2536_s22 = scalar_lea.vmem %s2535_s7, 1536 }
 0x1ff   : > { %p2537_p2 = scmp.lt.s32.totalorder %s3013_s16, %s2535_s7  ;;  %p2538_p13 = scmp.lt.s32.totalorder %s2536_s22, %s2530_s29 }
 0x200   : > { %p2533_p10 = pneg %p2532_p12 }
 0x201   : > { %p2539_p0 = por %p2538_p13, %p2537_p2 }
 0x203   : > { %p2540_p5 = pnand %p2539_p0, %p2533_p10 }
 0x205   : > { %2543 = shalt.err (!%p2540_p5)
}
 0x206   : > { %s2544_s24 = scalar_lea.hbm %s3020_s27, 768  ;;  %s2548_s23 = scalar_lea.hbm %s3096_s5, 1536 }
 0x207   : > { %p2545_p9 = scmp.ne.s32.totalorder %s3020_s27, %s2544_s24  ;;  %p2549_p7 = scmp.lt.s32.totalorder %s3020_s27, %s3096_s5 }
 0x208   : > { %p2550_p4 = scmp.lt.s32.totalorder %s2548_s23, %s2544_s24 }
 0x209   : > { %p2546_p1 = pnand %p2545_p9, %p3116_p3 }
 0x20a   : > { %p2551_p8 = por %p2550_p4, %p2549_p7 }
 0x20b   : > { %p2547_p6 = pneg %p2546_p1 }
 0x20d   : > { %p2552_p11 = pnand %p2551_p8, %p2547_p6 }
 0x20f   : > { %2555 = shalt.err (!%p2552_p11)
}
 0x210   : > { %2377 = dma.vmem_to_hbm [thread:$0]  (%p3116_p3), %s3013_s16, 768, %s3020_s27, %s2041_s28, %s2621_s9, %s2621_s9, %s2622_s10  }
 0x211 PF: > { %s2087_s15 = sand.u32 1, %s2590_s18   ;;  %p3117_p12 = scmp.ne.s32.totalorder %s3102_s25, 0 }
 0x212   : > { %p3118_p10 = scmp.ge.s32.totalorder %s2602_s21, 2  ;;  %s2088_s17 = scalar_lea.sflag [#allocation4], %s2087_s15 }
 0x214   : > { %p2389_p2 = pnand %p3118_p10, %p3117_p12 }
 0x216   : > { %p2390_p13 = pneg %p2389_p2 }
 0x218   : > { %2581 = dma.done.wait (%p2390_p13), %s2088_s17, 768  }
 0x219   : > { %2583 = vsyncadd (%p2390_p13), %s2088_s17, 4294966528  ;;  %s2097_s29 = scalar_lea.sflag [#allocation9], %s2087_s15 }
 0x21a   : > { %2585 = dma.done.wait (%p2390_p13), %s2097_s29, 768  }
 0x21b   : > { %2587 = vsyncadd (%p2390_p13), %s2097_s29, 4294966528  ;;  %p23_p3 = scmp.ge.s32.totalorder %s2708_s30, 4   ;;  %s3119_s18 = smov %s2594_s19 }
 0x21c   : > { %s3120_s19 = smov %s2598_s20  ;;  %s3121_s20 = smov %s2725_s13 }
 0x21d   : > { %s3122_s21 = smov %s2708_s30  ;;  %25 = sbr.rel (!%p23_p3) target bundleno = 8 (0x8), region = 111 }
 0x222   :  { %2102 = vsyncpa [#allocation3], 1 }
 0x223   :  { %2104 = vsyncpa [#allocation3 + $0x1], 1 }
 0x224   :  { %2105 = vsyncpa [#allocation6], 1 }
 0x225   :  { %2107 = vsyncpa [#allocation6 + $0x1], 1 }
 0x226   :  { %2108 = vsyncpa [#allocation4], 1 }
 0x227   :  { %2110 = vsyncpa [#allocation4 + $0x1], 1 }
 0x228   :  { %2111 = vsyncpa [#allocation9], 1 }
 0x229   :  { %2113 = vsyncpa [#allocation9 + $0x1], 1 }

</bundles_post_ra>
